<compile_context>
chip_gen: v5e
topology: v5e:2x2
jax: 0.10.0
libtpu: 0.0.40
codegen_flags: <defaults>
</compile_context>

<pallas_src>
import math

import jax
import jax.numpy as jnp
from jax.experimental import pallas as pl
from jax.experimental.pallas import tpu as pltpu

BN_EPS = 1e-5  # nn.BatchNorm3d default eps


# Kernel-facing layout per PyTorch `dim`. The kernel always sees x as
# (N, A, B, L) where one of A/B is the ZPool axis P (pool_axis), the other is
# the conv "row" axis S1 (zero-padded by 3 on each side in VMEM scratch) and
# L = S2*S3 is the merged, lane-dense conv minor axis.
#   perm      : permutation applied to channel-last (N, D, H, W, C) storage
#               (identity == no HBM transpose, only a free reshape).
#   pool_axis : position of P inside the (A, B, L) kernel block (0 or 1).
#   w_axes    : permutation taking the (kd, kh, kw, channel) Conv3d taps to
#               (S1-tap, S2-tap, S3-tap, channel) order.
_LAYOUTS = {
    1: ((0, 4, 1, 2, 3), 0, (0, 1, 2, 3)),   # pool C ; conv (D | H, W)
    2: ((0, 1, 2, 3, 4), 0, (1, 2, 0, 3)),   # pool D ; conv (H | W, C)  (no transpose)
    3: ((0, 1, 2, 3, 4), 1, (0, 2, 1, 3)),   # pool H ; conv (D | W, C)  (no transpose)
    4: ((0, 3, 1, 2, 4), 0, (0, 1, 2, 3)),   # pool W ; conv (D | H, C)
}
_IDENTITY = (0, 1, 2, 3, 4)


def _inverse_perm(perm):
    inv = [0] * len(perm)
    for i, p in enumerate(perm):
        inv[p] = i
    return tuple(inv)


def _build_toeplitz(w7, w_axes, bn_scale, S2, S3):
    """Fold the S2/S3 taps, their 'same' zero padding and the BatchNorm scale
    into 7 Toeplitz slabs over the merged L = S2*S3 lane axis.

    w7: (7, 7, 7, 2) Conv3d(2, 1, 7, bias=False) weights, tap order
        (kd, kh, kw), channel 0 = max-pooled map, channel 1 = mean-pooled map.
    Returns wt: (7, 2L, L) f32; rows [0, L) act on the max plane, rows [L, 2L)
    on the mean plane, so max & mean fuse into ONE GEMM per S1 tap.
    """
    L = S2 * S3
    w = jnp.transpose(w7.astype(jnp.float32), w_axes) * bn_scale  # (7,7,7,2)
    # sel[k, u, q] = 1 iff u == q + k - 3; out-of-range source rows are simply
    # never selected, which implements the zero 'same' padding along S2 / S3.
    sel2 = (jnp.arange(S2)[None, :, None] ==
            jnp.arange(S2)[None, None, :] + jnp.arange(7)[:, None, None] - 3
            ).astype(jnp.float32)                                  # (7,S2,S2)
    sel3 = (jnp.arange(S3)[None, :, None] ==
            jnp.arange(S3)[None, None, :] + jnp.arange(7)[:, None, None] - 3
            ).astype(jnp.float32)                                  # (7,S3,S3)
    t = jnp.einsum('kabc,aup,bvq->kcuvpq', w, sel2, sel3)  # (7,2,S2,S3,S2,S3)
    t = t.reshape(7, 2, L, L)
    return t.reshape(7, 2 * L, L)


def _make_kernel(A, B, L, pool_axis):
    S1 = B if pool_axis == 0 else A
    P = A if pool_axis == 0 else B
    inv_p = 1.0 / P
    S1p = S1 + 6

    def kernel(x_ref, wt_ref, sh_ref, o_ref, pcat_ref):
        xv = x_ref[...]                                    # (A, B, L)
        # NOTE: for bf16 activations on v6e/v7x the max + gating path could
        # stay in bf16; the toy input here is f32 so everything is f32.
        xf = xv.astype(jnp.float32)

        # ---- ZPool: max + mean over the pool axis ---------------------------
        mx = jnp.max(xf, axis=pool_axis)                   # (S1, L)
        mn = jnp.sum(xf, axis=pool_axis) * inv_p           # (S1, L)

        # ---- padded pooled planes (max | mean side by side) in VMEM scratch -
        # Only the two 3-row halos are zeroed; the interior is fully rewritten
        # every step.  Zeroed every step (not under pl.when(program_id == 0))
        # so the kernel stays correct when the "parallel" grid axis is split
        # across TensorCores.
        halo = jnp.zeros((3, 2 * L), jnp.float32)
        pcat_ref[0:3, :] = halo
        pcat_ref[S1 + 3:S1 + 6, :] = halo
        pcat_ref[3:S1 + 3, 0:L] = mx
        pcat_ref[3:S1 + 3, L:2 * L] = mn

        # ---- 7x7x7 conv + BatchNorm as 7 fused GEMMs -------------------------
        # S2/S3 taps, their padding and the BN scale live in the (2L, L)
        # Toeplitz slabs; max & mean contract in the same GEMM.  Two
        # independent accumulators break the serial add chain; the BN shift
        # initializes acc0 so no epilogue add is needed.
        acc0 = jnp.full((S1, L), sh_ref[0], jnp.float32)
        acc1 = jnp.zeros((S1, L), jnp.float32)
        accs = [acc0, acc1]
        for k1 in range(7):                    # 7 row-only (major-axis) slices
            win = pcat_ref[k1:k1 + S1, :]      # (S1, 2L)
            accs[k1 % 2] = accs[k1 % 2] + jnp.dot(
                win, wt_ref[k1], preferred_element_type=jnp.float32)
        att = jax.nn.sigmoid(accs[0] + accs[1])            # (S1, L)

        # ---- gate x: broadcast the attention over the pool axis --------------
        out = xf * jnp.expand_dims(att, pool_axis)
        o_ref[...] = out.astype(o_ref.dtype)

    return kernel, S1p


def dim_attention_forward(x, w7, bn_gamma, bn_beta, bn_mean, bn_var, *, dim):
    """DimAttention forward.

    x:  (N, D, H, W, C) channel-last activations (== PyTorch NCDHW input).
    w7: (7, 7, 7, 2) Conv3d(2, 1, 7, bias=False) weights, channel 0 = max,
        channel 1 = mean (PyTorch weight[0, c, kd, kh, kw] == w7[kd, kh, kw, c]).
    dim follows the PyTorch module: 1 = channel, 2/3/4 = D/H/W.
    """
    perm, pool_axis, w_axes = _LAYOUTS[dim]
    xt = x if perm == _IDENTITY else jnp.transpose(x, perm)
    N, A, B, S2, S3 = xt.shape
    L = S2 * S3
    xk = xt.reshape(N, A, B, L)            # free contiguous merge of (S2, S3)

    # Eval-mode BatchNorm folded into a scale (-> Toeplitz weights) + shift.
    bn_scale = bn_gamma * jax.lax.rsqrt(bn_var + BN_EPS)
    bn_shift = (bn_beta - bn_mean * bn_scale).reshape(1).astype(jnp.float32)
    wt = _build_toeplitz(w7, w_axes, bn_scale, S2, S3)      # (7, 2L, L)

    kernel, S1p = _make_kernel(A, B, L, pool_axis)
    out_k = pl.pallas_call(
        kernel,
        out_shape=jax.ShapeDtypeStruct(xk.shape, x.dtype),
        grid=(N,),
        in_specs=[
            pl.BlockSpec((None, A, B, L), lambda n: (n, 0, 0, 0)),
            pl.BlockSpec((7, 2 * L, L), lambda n: (0, 0, 0)),
            pl.BlockSpec(memory_space=pltpu.MemorySpace.SMEM),   # bn_shift scalar
        ],
        out_specs=pl.BlockSpec((None, A, B, L), lambda n: (n, 0, 0, 0)),
        scratch_shapes=[pltpu.VMEM((S1p, 2 * L), jnp.float32)],  # padded pooled planes
        compiler_params=pltpu.CompilerParams(
            dimension_semantics=("parallel",),
            vmem_limit_bytes=32 * 1024 * 1024),
    )(xk, wt, bn_shift)

    out_t = out_k.reshape(N, A, B, S2, S3)
    if perm == _IDENTITY:
        return out_t
    return jnp.transpose(out_t, _inverse_perm(perm))


# --------------------- pure-JAX reference (PyTorch NCDHW semantics) -----------

def dim_attention_reference(x, w7, bn_gamma, bn_beta, bn_mean, bn_var, *, dim):
    x_pt = jnp.transpose(x, (0, 4, 1, 2, 3))            # (N, C, D, H, W)
    xt = jnp.swapaxes(x_pt, dim, 1)
    mx = jnp.max(xt, axis=1, keepdims=True)
    mn = jnp.mean(xt, axis=1, keepdims=True)
    pooled = jnp.concatenate([mx, mn], axis=1)           # (N, 2, S1, S2, S3)
    w_pt = jnp.transpose(w7, (3, 0, 1, 2))[None]         # (1, 2, 7, 7, 7)
    conv = jax.lax.conv_general_dilated(
        pooled, w_pt, window_strides=(1, 1, 1), padding=[(3, 3)] * 3,
        dimension_numbers=('NCDHW', 'OIDHW', 'NCDHW'),
        precision=jax.lax.Precision.HIGHEST)
    scale = bn_gamma * jax.lax.rsqrt(bn_var + BN_EPS)
    att = jax.nn.sigmoid(conv * scale + (bn_beta - bn_mean * scale))
    out = xt * att
    out = jnp.swapaxes(out, dim, 1)
    return jnp.transpose(out, (0, 2, 3, 4, 1))


if __name__ == "__main__":
    key = jax.random.PRNGKey(0)
    kx, kcw, kg, kb = jax.random.split(key, 4)

    # PyTorch input (N, C, D, H, W) = (2, 16, 8, 8, 16), stored channel-last.
    N, D, H, W, C = 2, 8, 8, 16, 16
    x = jax.random.normal(kx, (N, D, H, W, C), jnp.float32)

    # Conv3d(2, 1, 7, padding=3, bias=False) weight + BatchNorm3d(1) params.
    w7 = jax.random.normal(kcw, (7, 7, 7, 2), jnp.float32) / math.sqrt(2 * 7 ** 3)
    bn_gamma = 1.0 + 0.1 * jax.random.normal(kg, (), jnp.float32)
    bn_beta = 0.1 * jax.random.normal(kb, (), jnp.float32)
    bn_mean = jnp.zeros((), jnp.float32)                 # eval-mode running stats
    bn_var = jnp.ones((), jnp.float32)

    fwd = jax.jit(dim_attention_forward, static_argnames=("dim",))
    ref = jax.jit(dim_attention_reference, static_argnames=("dim",))

    for dim in (1, 2, 3, 4):
        y = jax.block_until_ready(
            fwd(x, w7, bn_gamma, bn_beta, bn_mean, bn_var, dim=dim))
        assert y.shape == x.shape, (dim, y.shape)
        assert bool(jnp.all(jnp.isfinite(y))), dim
        y_ref = ref(x, w7, bn_gamma, bn_beta, bn_mean, bn_var, dim=dim)
        err = float(jnp.max(jnp.abs(y - y_ref)))
        assert err < 1e-3, (dim, err)

    print("KERNEL_OK")
</pallas_src>

<mosaic_0001>
module attributes {stable_mosaic.version = 11 : i64} {
  func.func @kernel(%arg0: i32, %arg1: memref<1x16x8x128xf32, #tpu.memory_space<vmem>>, %arg2: memref<7x256x128xf32, #tpu.memory_space<vmem>>, %arg3: memref<1xf32, #tpu.memory_space<smem>>, %arg4: memref<1x16x8x128xf32, #tpu.memory_space<vmem>>, %arg5: memref<14x256xf32, #tpu.memory_space<vmem>>) attributes {dimension_semantics = [#tpu.dimension_semantics<parallel>], iteration_bounds = array<i64: 2>, scalar_prefetch = 0 : i64, scratch_operands = 1 : i64, tpu.core_type = #tpu.core_type<tc>, window_params = [{transform_indices = @transform_0, window_bounds = array<i64: 1, 16, 8, 128>}, {pipeline_mode = #tpu.pipeline_mode<synchronous>, transform_indices = @transform_1, window_bounds = array<i64: 7, 256, 128>}, {transform_indices = @transform_2, window_bounds = array<i64: 1>}, {transform_indices = @transform_3, window_bounds = array<i64: 1, 16, 8, 128>}]} {
    %c0 = arith.constant 0 : index
    %c0_0 = arith.constant 0 : index
    %c0_1 = arith.constant 0 : index
    %c0_2 = arith.constant 0 : index
    %0 = vector.load %arg1[%c0, %c0_0, %c0_1, %c0_2] : memref<1x16x8x128xf32, #tpu.memory_space<vmem>>, vector<1x16x8x128xf32>
    %1 = vector.shape_cast %0 : vector<1x16x8x128xf32> to vector<16x8x128xf32>
    %cst = arith.constant dense<0xFF800000> : vector<8x128xf32>
    %2 = vector.multi_reduction <maximumf>, %1, %cst [0] : vector<16x8x128xf32> to vector<8x128xf32>
    %cst_3 = arith.constant dense<0.000000e+00> : vector<8x128xf32>
    %3 = vector.multi_reduction <add>, %1, %cst_3 [0] : vector<16x8x128xf32> to vector<8x128xf32>
    %cst_4 = arith.constant 6.250000e-02 : f32
    %4 = vector.broadcast %cst_4 : f32 to vector<8x128xf32>
    %5 = arith.mulf %3, %4 : vector<8x128xf32>
    %cst_5 = arith.constant 0.000000e+00 : f32
    %6 = vector.broadcast %cst_5 : f32 to vector<3x256xf32>
    %c0_6 = arith.constant 0 : index
    %c0_7 = arith.constant 0 : index
    %7 = vector.load %arg5[%c0_6, %c0_7] : memref<14x256xf32, #tpu.memory_space<vmem>>, vector<3x256xf32>
    tpu.vector_store %arg5[%c0_6, %c0_7], %6 {strides = array<i32>} : memref<14x256xf32, #tpu.memory_space<vmem>>, vector<3x256xf32>,
    %c11 = arith.constant 11 : index
    %c0_8 = arith.constant 0 : index
    %8 = vector.load %arg5[%c11, %c0_8] : memref<14x256xf32, #tpu.memory_space<vmem>>, vector<3x256xf32>
    tpu.vector_store %arg5[%c11, %c0_8], %6 {strides = array<i32>} : memref<14x256xf32, #tpu.memory_space<vmem>>, vector<3x256xf32>,
    %c3 = arith.constant 3 : index
    %c0_9 = arith.constant 0 : index
    %9 = vector.load %arg5[%c3, %c0_9] : memref<14x256xf32, #tpu.memory_space<vmem>>, vector<8x128xf32>
    tpu.vector_store %arg5[%c3, %c0_9], %2 {strides = array<i32>} : memref<14x256xf32, #tpu.memory_space<vmem>>, vector<8x128xf32>,
    %c3_10 = arith.constant 3 : index
    %c128 = arith.constant 128 : index
    %10 = vector.load %arg5[%c3_10, %c128] : memref<14x256xf32, #tpu.memory_space<vmem>>, vector<8x128xf32>
    tpu.vector_store %arg5[%c3_10, %c128], %5 {strides = array<i32>} : memref<14x256xf32, #tpu.memory_space<vmem>>, vector<8x128xf32>,
    %c0_11 = arith.constant 0 : index
    %11 = memref.load %arg3[%c0_11] : memref<1xf32, #tpu.memory_space<smem>>
    %12 = vector.broadcast %11 : f32 to vector<8x128xf32>
    %cst_12 = arith.constant 0.000000e+00 : f32
    %13 = vector.broadcast %cst_12 : f32 to vector<8x128xf32>
    %c0_13 = arith.constant 0 : index
    %c0_14 = arith.constant 0 : index
    %14 = vector.load %arg5[%c0_13, %c0_14] : memref<14x256xf32, #tpu.memory_space<vmem>>, vector<8x256xf32>
    %c0_15 = arith.constant 0 : index
    %c0_16 = arith.constant 0 : index
    %c0_17 = arith.constant 0 : index
    %15 = vector.load %arg2[%c0_15, %c0_16, %c0_17] : memref<7x256x128xf32, #tpu.memory_space<vmem>>, vector<1x256x128xf32>
    %16 = vector.shape_cast %15 : vector<1x256x128xf32> to vector<256x128xf32>
    %cst_18 = arith.constant dense<0.000000e+00> : vector<8x128xf32>
    %17 = tpu.matmul %14, %16, %cst_18 {dimension_numbers = #tpu.dot_dimension_numbers<[1], [0], [0], [1], [0, 0, 1, 1], [], []>} : vector<8x256xf32>, vector<256x128xf32>, vector<8x128xf32> -> vector<8x128xf32>
    %18 = arith.addf %12, %17 : vector<8x128xf32>
    %c1 = arith.constant 1 : index
    %c0_19 = arith.constant 0 : index
    %19 = vector.load %arg5[%c1, %c0_19] : memref<14x256xf32, #tpu.memory_space<vmem>>, vector<8x256xf32>
    %c1_20 = arith.constant 1 : index
    %c0_21 = arith.constant 0 : index
    %c0_22 = arith.constant 0 : index
    %20 = vector.load %arg2[%c1_20, %c0_21, %c0_22] : memref<7x256x128xf32, #tpu.memory_space<vmem>>, vector<1x256x128xf32>
    %21 = vector.shape_cast %20 : vector<1x256x128xf32> to vector<256x128xf32>
    %cst_23 = arith.constant dense<0.000000e+00> : vector<8x128xf32>
    %22 = tpu.matmul %19, %21, %cst_23 {dimension_numbers = #tpu.dot_dimension_numbers<[1], [0], [0], [1], [0, 0, 1, 1], [], []>} : vector<8x256xf32>, vector<256x128xf32>, vector<8x128xf32> -> vector<8x128xf32>
    %23 = arith.addf %13, %22 : vector<8x128xf32>
    %c2 = arith.constant 2 : index
    %c0_24 = arith.constant 0 : index
    %24 = vector.load %arg5[%c2, %c0_24] : memref<14x256xf32, #tpu.memory_space<vmem>>, vector<8x256xf32>
    %c2_25 = arith.constant 2 : index
    %c0_26 = arith.constant 0 : index
    %c0_27 = arith.constant 0 : index
    %25 = vector.load %arg2[%c2_25, %c0_26, %c0_27] : memref<7x256x128xf32, #tpu.memory_space<vmem>>, vector<1x256x128xf32>
    %26 = vector.shape_cast %25 : vector<1x256x128xf32> to vector<256x128xf32>
    %cst_28 = arith.constant dense<0.000000e+00> : vector<8x128xf32>
    %27 = tpu.matmul %24, %26, %cst_28 {dimension_numbers = #tpu.dot_dimension_numbers<[1], [0], [0], [1], [0, 0, 1, 1], [], []>} : vector<8x256xf32>, vector<256x128xf32>, vector<8x128xf32> -> vector<8x128xf32>
    %28 = arith.addf %18, %27 : vector<8x128xf32>
    %c3_29 = arith.constant 3 : index
    %c0_30 = arith.constant 0 : index
    %29 = vector.load %arg5[%c3_29, %c0_30] : memref<14x256xf32, #tpu.memory_space<vmem>>, vector<8x256xf32>
    %c3_31 = arith.constant 3 : index
    %c0_32 = arith.constant 0 : index
    %c0_33 = arith.constant 0 : index
    %30 = vector.load %arg2[%c3_31, %c0_32, %c0_33] : memref<7x256x128xf32, #tpu.memory_space<vmem>>, vector<1x256x128xf32>
    %31 = vector.shape_cast %30 : vector<1x256x128xf32> to vector<256x128xf32>
    %cst_34 = arith.constant dense<0.000000e+00> : vector<8x128xf32>
    %32 = tpu.matmul %29, %31, %cst_34 {dimension_numbers = #tpu.dot_dimension_numbers<[1], [0], [0], [1], [0, 0, 1, 1], [], []>} : vector<8x256xf32>, vector<256x128xf32>, vector<8x128xf32> -> vector<8x128xf32>
    %33 = arith.addf %23, %32 : vector<8x128xf32>
    %c4 = arith.constant 4 : index
    %c0_35 = arith.constant 0 : index
    %34 = vector.load %arg5[%c4, %c0_35] : memref<14x256xf32, #tpu.memory_space<vmem>>, vector<8x256xf32>
    %c4_36 = arith.constant 4 : index
    %c0_37 = arith.constant 0 : index
    %c0_38 = arith.constant 0 : index
    %35 = vector.load %arg2[%c4_36, %c0_37, %c0_38] : memref<7x256x128xf32, #tpu.memory_space<vmem>>, vector<1x256x128xf32>
    %36 = vector.shape_cast %35 : vector<1x256x128xf32> to vector<256x128xf32>
    %cst_39 = arith.constant dense<0.000000e+00> : vector<8x128xf32>
    %37 = tpu.matmul %34, %36, %cst_39 {dimension_numbers = #tpu.dot_dimension_numbers<[1], [0], [0], [1], [0, 0, 1, 1], [], []>} : vector<8x256xf32>, vector<256x128xf32>, vector<8x128xf32> -> vector<8x128xf32>
    %38 = arith.addf %28, %37 : vector<8x128xf32>
    %c5 = arith.constant 5 : index
    %c0_40 = arith.constant 0 : index
    %39 = vector.load %arg5[%c5, %c0_40] : memref<14x256xf32, #tpu.memory_space<vmem>>, vector<8x256xf32>
    %c5_41 = arith.constant 5 : index
    %c0_42 = arith.constant 0 : index
    %c0_43 = arith.constant 0 : index
    %40 = vector.load %arg2[%c5_41, %c0_42, %c0_43] : memref<7x256x128xf32, #tpu.memory_space<vmem>>, vector<1x256x128xf32>
    %41 = vector.shape_cast %40 : vector<1x256x128xf32> to vector<256x128xf32>
    %cst_44 = arith.constant dense<0.000000e+00> : vector<8x128xf32>
    %42 = tpu.matmul %39, %41, %cst_44 {dimension_numbers = #tpu.dot_dimension_numbers<[1], [0], [0], [1], [0, 0, 1, 1], [], []>} : vector<8x256xf32>, vector<256x128xf32>, vector<8x128xf32> -> vector<8x128xf32>
    %43 = arith.addf %33, %42 : vector<8x128xf32>
    %c6 = arith.constant 6 : index
    %c0_45 = arith.constant 0 : index
    %44 = vector.load %arg5[%c6, %c0_45] : memref<14x256xf32, #tpu.memory_space<vmem>>, vector<8x256xf32>
    %c6_46 = arith.constant 6 : index
    %c0_47 = arith.constant 0 : index
    %c0_48 = arith.constant 0 : index
    %45 = vector.load %arg2[%c6_46, %c0_47, %c0_48] : memref<7x256x128xf32, #tpu.memory_space<vmem>>, vector<1x256x128xf32>
    %46 = vector.shape_cast %45 : vector<1x256x128xf32> to vector<256x128xf32>
    %cst_49 = arith.constant dense<0.000000e+00> : vector<8x128xf32>
    %47 = tpu.matmul %44, %46, %cst_49 {dimension_numbers = #tpu.dot_dimension_numbers<[1], [0], [0], [1], [0, 0, 1, 1], [], []>} : vector<8x256xf32>, vector<256x128xf32>, vector<8x128xf32> -> vector<8x128xf32>
    %48 = arith.addf %38, %47 : vector<8x128xf32>
    %49 = arith.addf %48, %43 : vector<8x128xf32>
    %50 = arith.negf %49 : vector<8x128xf32>
    %51 = math.exp %50 : vector<8x128xf32>
    %cst_50 = arith.constant 1.000000e+00 : f32
    %52 = vector.broadcast %cst_50 : f32 to vector<8x128xf32>
    %53 = arith.addf %52, %51 : vector<8x128xf32>
    %54 = arith.divf %52, %53 : vector<8x128xf32>
    %55 = vector.shape_cast %54 : vector<8x128xf32> to vector<1x8x128xf32>
    %56 = vector.broadcast %55 : vector<1x8x128xf32> to vector<16x8x128xf32>
    %57 = arith.mulf %1, %56 : vector<16x8x128xf32>
    %c0_51 = arith.constant 0 : index
    %c0_52 = arith.constant 0 : index
    %c0_53 = arith.constant 0 : index
    %c0_54 = arith.constant 0 : index
    %58 = vector.load %arg4[%c0_51, %c0_52, %c0_53, %c0_54] : memref<1x16x8x128xf32, #tpu.memory_space<vmem>>, vector<1x16x8x128xf32>
    %59 = vector.shape_cast %58 : vector<1x16x8x128xf32> to vector<16x8x128xf32>
    %60 = vector.shape_cast %57 : vector<16x8x128xf32> to vector<1x16x8x128xf32>
    tpu.vector_store %arg4[%c0_51, %c0_52, %c0_53, %c0_54], %60 {strides = array<i32>} : memref<1x16x8x128xf32, #tpu.memory_space<vmem>>, vector<1x16x8x128xf32>,
    return
  }
  func.func @transform_0(%arg0: i32) -> (i32, i32, i32, i32) {
    %c0_i32 = arith.constant 0 : i32
    %c0_i32_0 = arith.constant 0 : i32
    %c0_i32_1 = arith.constant 0 : i32
    %c0_i32_2 = arith.constant 0 : i32
    return %arg0, %c0_i32, %c0_i32_0, %c0_i32_1 : i32, i32, i32, i32
  }
  func.func @transform_1(%arg0: i32) -> (i32, i32, i32) {
    %c0_i32 = arith.constant 0 : i32
    %c0_i32_0 = arith.constant 0 : i32
    %c0_i32_1 = arith.constant 0 : i32
    %c0_i32_2 = arith.constant 0 : i32
    return %c0_i32, %c0_i32_0, %c0_i32_1 : i32, i32, i32
  }
  func.func @transform_2(%arg0: i32) -> i32 {
    %c0_i32 = arith.constant 0 : i32
    %c0_i32_0 = arith.constant 0 : i32
    return %c0_i32 : i32
  }
  func.func @transform_3(%arg0: i32) -> (i32, i32, i32, i32) {
    %c0_i32 = arith.constant 0 : i32
    %c0_i32_0 = arith.constant 0 : i32
    %c0_i32_1 = arith.constant 0 : i32
    %c0_i32_2 = arith.constant 0 : i32
    return %arg0, %c0_i32, %c0_i32_0, %c0_i32_1 : i32, i32, i32, i32
  }
}

</mosaic_0001>

<bundles_post_ra>
// kernel: dim_attention_forward.1
= control target key start
LH: loop header
LB: loop body
LE: loop exit
PB: predicated region body
PF: predicated region fallthrough
CT: control target
= control target key end

     0   :  { %s1212_s14 = smov 0   ;;  %s2046_s0 = inlined_call_operand.vmem [shape: f32[2,16,8,128], index: 0, kind: input, shape index: {}]   ;;  %s2047_s1 = inlined_call_operand.vmem [shape: f32[7,256,128], index: 1, kind: input, shape index: {}]   ;;  %s2048_s2 = inlined_call_operand.<no memory space> [shape: f32[1], index: 2, kind: input, shape index: {}]   ;;  %s2049_s3 = inlined_call_operand.vmem [shape: f32[2,16,8,128], index: 3, kind: output, shape index: {}]  }
   0x1   :  { %8 = sst [smem:[#allocation3]] %s2048_s2 }
   0x2 LB: > { %s961_s15 = sadd.s32 4294967295, %s1186_s14   ;;  %p965_p0 = scmp.ge.s32.totalorder %s1186_s14, 1  ;;  %s1186_s14 = sphi %s1212_s14, %s14_s14  }
   0x3   : > { %p138_p1 = scmp.lt.s32.totalorder %s1186_s14, 3 }
   0x5   : > { %p139_p2 = pnand %p965_p0, %p138_p1 }
   0x6   : > { %p1396_p3 = scmp.lt.s32.totalorder (!%p139_p2), %s961_s15, 1  ;;  %s233_s11 = sld [smem:[#allocation3]] (!%p139_p2) }
   0x7   : > { %142 = sbr.rel (%p139_p2) target bundleno = 334 (0x14e), region = 32 }
   0xc   : > { %v252_v0 = vld [vmem:[%s2047_s1 + $0x78] sm:$0xff]  ;;  %v251_v4 = vld [vmem:[%s2047_s1 + $0x70] sm:$0xff]  ;;  %v250_v8 = vld [vmem:[%s2047_s1 + $0x68] sm:$0xff]  ;;  %s2052_s15 = smov (!%p1396_p3, %s961_s15), 1  ;;  %vm388_vm0 = vcmask 1045504   ;;  %vm479_vm1 = vcmask 1044480  }
   0xd   : > { %v268_v1 = vld [vmem:[%s2047_s1 + $0xf8] sm:$0xff]  ;;  %269 = vmatpush.msra.mxu0 %v252_v0  ;;  %v267_v5 = vld [vmem:[%s2047_s1 + $0xf0] sm:$0xff]  ;;  %v266_v9 = vld [vmem:[%s2047_s1 + $0xe8] sm:$0xff]  ;;  %v1188_v0 = vmov 0.0   ;;  %s1165_s7 = sshll.u32 %s2052_s15, 7  ;;  %vm532_vm2 = vcmask 1046528  }
   0xe   : > { %v1017_v2 = vld [vmem:[%s2047_s1 + $0x278] sm:$0xff]  ;;  %289 = vmatpush.msra.mxu1 %v268_v1  ;;  %v1016_v6 = vld [vmem:[%s2047_s1 + $0x270] sm:$0xff]  ;;  %v1015_v10 = vld [vmem:[%s2047_s1 + $0x268] sm:$0xff]  ;;  %219 = vst [vmem:[#allocation2 + $0x10] sm:$0x7] %v1188_v0  ;;  %s1484_s27 = scalar_lea.vmem %s2046_s0, %s1165_s7  ;;  %vm622_vm3 = vcmask 1043456   ;;  %s2009_s16 = scalar_lea.vmem %s2049_s3, %s1165_s7 }
   0xf   : > { %v1033_v3 = vld [vmem:[%s2047_s1 + $0x2f8] sm:$0xff]  ;;  %397 = vmatpush.msra.mxu2 %v1017_v2  ;;  %v1032_v7 = vld [vmem:[%s2047_s1 + $0x2f0] sm:$0xff]  ;;  %270 = vmatpush.msra.mxu0 %v251_v4  ;;  %v1031_v11 = vld [vmem:[%s2047_s1 + $0x2e8] sm:$0xff]  ;;  %220 = vst [vmem:[#allocation2] sm:$0x7] %v1188_v0  ;;  %vm713_vm4 = vcmask 1042432  }
  0x10   : > { %417 = vmatpush.msra.mxu3 %v1033_v3  ;;  %290 = vmatpush.msra.mxu1 %v267_v5  ;;  %v249_v12 = vld [vmem:[%s2047_s1 + $0x60] sm:$0xff]  ;;  %v248_v16 = vld [vmem:[%s2047_s1 + $0x58] sm:$0xff]  ;;  %v247_v20 = vld [vmem:[%s2047_s1 + $0x50] sm:$0xff]  ;;  %221 = vst [vmem:[#allocation2 + $0x18] sm:$0x38] %v1188_v0  ;;  %vm804_vm5 = vcmask 1041408  }
  0x11   : > { %398 = vmatpush.msra.mxu2 %v1016_v6  ;;  %v265_v13 = vld [vmem:[%s2047_s1 + $0xe0] sm:$0xff]  ;;  %271 = vmatpush.msra.mxu0 %v250_v8  ;;  %v264_v17 = vld [vmem:[%s2047_s1 + $0xd8] sm:$0xff]  ;;  %v263_v21 = vld [vmem:[%s2047_s1 + $0xd0] sm:$0xff]  ;;  %222 = vst [vmem:[#allocation2 + $0x8] sm:$0x38] %v1188_v0 }
  0x12   : > { %418 = vmatpush.msra.mxu3 %v1032_v7  ;;  %291 = vmatpush.msra.mxu1 %v266_v9  ;;  %v1014_v14 = vld [vmem:[%s2047_s1 + $0x260] sm:$0xff]  ;;  %v1013_v18 = vld [vmem:[%s2047_s1 + $0x258] sm:$0xff]  ;;  %v1012_v22 = vld [vmem:[%s2047_s1 + $0x250] sm:$0xff] }
  0x13   : > { %v1030_v15 = vld [vmem:[%s2047_s1 + $0x2e0] sm:$0xff]  ;;  %399 = vmatpush.msra.mxu2 %v1015_v10  ;;  %272 = vmatpush.msra.mxu0 %v249_v12  ;;  %v1029_v19 = vld [vmem:[%s2047_s1 + $0x2d8] sm:$0xff]  ;;  %v1028_v23 = vld [vmem:[%s2047_s1 + $0x2d0] sm:$0xff] }
  0x14   : > { %419 = vmatpush.msra.mxu3 %v1031_v11  ;;  %292 = vmatpush.msra.mxu1 %v265_v13  ;;  %v246_v24 = vld [vmem:[%s2047_s1 + $0x48] sm:$0xff]  ;;  %v245_v28 = vld [vmem:[%s2047_s1 + $0x40] sm:$0xff]  ;;  %v244_v32 = vld [vmem:[%s2047_s1 + $0x38] sm:$0xff] }
  0x15   : > { %400 = vmatpush.msra.mxu2 %v1014_v14  ;;  %273 = vmatpush.msra.mxu0 %v248_v16  ;;  %v262_v25 = vld [vmem:[%s2047_s1 + $0xc8] sm:$0xff]  ;;  %v261_v29 = vld [vmem:[%s2047_s1 + $0xc0] sm:$0xff]  ;;  %v260_v33 = vld [vmem:[%s2047_s1 + $0xb8] sm:$0xff] }
  0x16   : > { %420 = vmatpush.msra.mxu3 %v1030_v15  ;;  %293 = vmatpush.msra.mxu1 %v264_v17  ;;  %v1011_v26 = vld [vmem:[%s2047_s1 + $0x248] sm:$0xff]  ;;  %v1010_v30 = vld [vmem:[%s2047_s1 + $0x240] sm:$0xff]  ;;  %v1009_v34 = vld [vmem:[%s2047_s1 + $0x238] sm:$0xff] }
  0x17   : > { %401 = vmatpush.msra.mxu2 %v1013_v18  ;;  %274 = vmatpush.msra.mxu0 %v247_v20  ;;  %v1027_v27 = vld [vmem:[%s2047_s1 + $0x2c8] sm:$0xff]  ;;  %v1026_v31 = vld [vmem:[%s2047_s1 + $0x2c0] sm:$0xff]  ;;  %v1025_v35 = vld [vmem:[%s2047_s1 + $0x2b8] sm:$0xff] }
  0x18   : > { %421 = vmatpush.msra.mxu3 %v1029_v19  ;;  %294 = vmatpush.msra.mxu1 %v263_v21  ;;  %v243_v36 = vld [vmem:[%s2047_s1 + $0x30] sm:$0xff]  ;;  %v242_v40 = vld [vmem:[%s2047_s1 + $0x28] sm:$0xff]  ;;  %v241_v44 = vld [vmem:[%s2047_s1 + $0x20] sm:$0xff] }
  0x19   : > { %402 = vmatpush.msra.mxu2 %v1012_v22  ;;  %275 = vmatpush.msra.mxu0 %v246_v24  ;;  %v259_v37 = vld [vmem:[%s2047_s1 + $0xb0] sm:$0xff]  ;;  %v258_v41 = vld [vmem:[%s2047_s1 + $0xa8] sm:$0xff]  ;;  %v257_v45 = vld [vmem:[%s2047_s1 + $0xa0] sm:$0xff] }
  0x1a   : > { %422 = vmatpush.msra.mxu3 %v1028_v23  ;;  %295 = vmatpush.msra.mxu1 %v262_v25  ;;  %v1008_v38 = vld [vmem:[%s2047_s1 + $0x230] sm:$0xff]  ;;  %v1007_v42 = vld [vmem:[%s2047_s1 + $0x228] sm:$0xff]  ;;  %v1006_v46 = vld [vmem:[%s2047_s1 + $0x220] sm:$0xff] }
  0x1b   : > { %403 = vmatpush.msra.mxu2 %v1011_v26  ;;  %276 = vmatpush.msra.mxu0 %v245_v28  ;;  %v1024_v39 = vld [vmem:[%s2047_s1 + $0x2b0] sm:$0xff]  ;;  %v1023_v43 = vld [vmem:[%s2047_s1 + $0x2a8] sm:$0xff]  ;;  %v1022_v47 = vld [vmem:[%s2047_s1 + $0x2a0] sm:$0xff] }
  0x1c   : > { %423 = vmatpush.msra.mxu3 %v1027_v27  ;;  %296 = vmatpush.msra.mxu1 %v261_v29  ;;  %v240_v48 = vld [vmem:[%s2047_s1 + $0x18] sm:$0xff]  ;;  %v239_v52 = vld [vmem:[%s2047_s1 + $0x10] sm:$0xff]  ;;  %v238_v56 = vld [vmem:[%s2047_s1 + $0x8] sm:$0xff] }
  0x1d   : > { %404 = vmatpush.msra.mxu2 %v1010_v30  ;;  %277 = vmatpush.msra.mxu0 %v244_v32  ;;  %v256_v49 = vld [vmem:[%s2047_s1 + $0x98] sm:$0xff]  ;;  %v255_v53 = vld [vmem:[%s2047_s1 + $0x90] sm:$0xff]  ;;  %v254_v57 = vld [vmem:[%s2047_s1 + $0x88] sm:$0xff] }
  0x1e   : > { %424 = vmatpush.msra.mxu3 %v1026_v31  ;;  %297 = vmatpush.msra.mxu1 %v260_v33  ;;  %v1005_v50 = vld [vmem:[%s2047_s1 + $0x218] sm:$0xff]  ;;  %v1004_v54 = vld [vmem:[%s2047_s1 + $0x210] sm:$0xff]  ;;  %v1003_v58 = vld [vmem:[%s2047_s1 + $0x208] sm:$0xff] }
  0x1f   : > { %405 = vmatpush.msra.mxu2 %v1009_v34  ;;  %278 = vmatpush.msra.mxu0 %v243_v36  ;;  %v1021_v51 = vld [vmem:[%s2047_s1 + $0x298] sm:$0xff]  ;;  %v1020_v55 = vld [vmem:[%s2047_s1 + $0x290] sm:$0xff]  ;;  %v1019_v59 = vld [vmem:[%s2047_s1 + $0x288] sm:$0xff] }
  0x20   : > { %425 = vmatpush.msra.mxu3 %v1025_v35  ;;  %298 = vmatpush.msra.mxu1 %v259_v37  ;;  %v237_v60 = vld [vmem:[%s2047_s1] sm:$0xff]  ;;  %v1049_v1 = vld [vmem:[%s2047_s1 + $0x378] sm:$0xff]  ;;  %v1048_v5 = vld [vmem:[%s2047_s1 + $0x370] sm:$0xff] }
  0x21   : > { %406 = vmatpush.msra.mxu2 %v1008_v38  ;;  %279 = vmatpush.msra.mxu0 %v242_v40  ;;  %v253_v61 = vld [vmem:[%s2047_s1 + $0x80] sm:$0xff]  ;;  %v1065_v2 = vld [vmem:[%s2047_s1 + $0x3f8] sm:$0xff]  ;;  %v1064_v6 = vld [vmem:[%s2047_s1 + $0x3f0] sm:$0xff] }
  0x22   : > { %426 = vmatpush.msra.mxu3 %v1024_v39  ;;  %299 = vmatpush.msra.mxu1 %v258_v41  ;;  %v1002_v62 = vld [vmem:[%s2047_s1 + $0x200] sm:$0xff]  ;;  %v985_v3 = vld [vmem:[%s2047_s1 + $0x178] sm:$0xff]  ;;  %v984_v7 = vld [vmem:[%s2047_s1 + $0x170] sm:$0xff] }
  0x23   : > { %407 = vmatpush.msra.mxu2 %v1007_v42  ;;  %280 = vmatpush.msra.mxu0 %v241_v44  ;;  %v1018_v63 = vld [vmem:[%s2047_s1 + $0x280] sm:$0xff]  ;;  %v1001_v4 = vld [vmem:[%s2047_s1 + $0x1f8] sm:$0xff]  ;;  %v1000_v8 = vld [vmem:[%s2047_s1 + $0x1f0] sm:$0xff] }
  0x24   : > { %427 = vmatpush.msra.mxu3 %v1023_v43  ;;  %300 = vmatpush.msra.mxu1 %v257_v45  ;;  %v1047_v9 = vld [vmem:[%s2047_s1 + $0x368] sm:$0xff]  ;;  %v1046_v13 = vld [vmem:[%s2047_s1 + $0x360] sm:$0xff]  ;;  %v1045_v17 = vld [vmem:[%s2047_s1 + $0x358] sm:$0xff] }
  0x25   : > { %408 = vmatpush.msra.mxu2 %v1006_v46  ;;  %281 = vmatpush.msra.mxu0 %v240_v48  ;;  %v1063_v10 = vld [vmem:[%s2047_s1 + $0x3e8] sm:$0xff]  ;;  %v1062_v14 = vld [vmem:[%s2047_s1 + $0x3e0] sm:$0xff]  ;;  %v1061_v18 = vld [vmem:[%s2047_s1 + $0x3d8] sm:$0xff] }
  0x26   : > { %428 = vmatpush.msra.mxu3 %v1022_v47  ;;  %301 = vmatpush.msra.mxu1 %v256_v49  ;;  %v983_v11 = vld [vmem:[%s2047_s1 + $0x168] sm:$0xff]  ;;  %v982_v15 = vld [vmem:[%s2047_s1 + $0x160] sm:$0xff]  ;;  %v981_v19 = vld [vmem:[%s2047_s1 + $0x158] sm:$0xff] }
  0x27   : > { %409 = vmatpush.msra.mxu2 %v1005_v50  ;;  %282 = vmatpush.msra.mxu0 %v239_v52  ;;  %v999_v12 = vld [vmem:[%s2047_s1 + $0x1e8] sm:$0xff]  ;;  %v998_v16 = vld [vmem:[%s2047_s1 + $0x1e0] sm:$0xff]  ;;  %v997_v20 = vld [vmem:[%s2047_s1 + $0x1d8] sm:$0xff] }
  0x28   : > { %429 = vmatpush.msra.mxu3 %v1021_v51  ;;  %302 = vmatpush.msra.mxu1 %v255_v53  ;;  %v1044_v21 = vld [vmem:[%s2047_s1 + $0x350] sm:$0xff]  ;;  %v1043_v25 = vld [vmem:[%s2047_s1 + $0x348] sm:$0xff]  ;;  %v1511_v27 = vld [vmem:[%s1484_s27] sm:$0xff] }
  0x29   : > { %410 = vmatpush.msra.mxu2 %v1004_v54  ;;  %283 = vmatpush.msra.mxu0 %v238_v56  ;;  %v1060_v22 = vld [vmem:[%s2047_s1 + $0x3d0] sm:$0xff]  ;;  %v1059_v26 = vld [vmem:[%s2047_s1 + $0x3c8] sm:$0xff]  ;;  %v1526_v32 = vld [vmem:[%s1484_s27 + $0x20] sm:$0xff] }
  0x2a   : > { %430 = vmatpush.msra.mxu3 %v1020_v55  ;;  %303 = vmatpush.msra.mxu1 %v254_v57  ;;  %v980_v23 = vld [vmem:[%s2047_s1 + $0x150] sm:$0xff]  ;;  %v1514_v28 = vld [vmem:[%s1484_s27 + $0x8] sm:$0xff]  ;;  %v1042_v35 = vld [vmem:[%s2047_s1 + $0x340] sm:$0xff]  ;;  %v188_v40 = vmax.f32 %v1511_v27, %v1526_v32 }
  0x2b   : > { %411 = vmatpush.msra.mxu2 %v1003_v58  ;;  %284 = vmatpush.msra.mxu0 %v237_v60  ;;  %v996_v24 = vld [vmem:[%s2047_s1 + $0x1d0] sm:$0xff]  ;;  %v979_v30 = vld [vmem:[%s2047_s1 + $0x148] sm:$0xff]  ;;  %v203_v34 = vadd.f32 %v1514_v28, %v1511_v27  ;;  %v1058_v36 = vld [vmem:[%s2047_s1 + $0x3c0] sm:$0xff] }
  0x2c   : > { %431 = vmatpush.msra.mxu3 %v1019_v59  ;;  %304 = vmatpush.msra.mxu1 %v253_v61  ;;  %v1517_v29 = vld [vmem:[%s1484_s27 + $0x10] sm:$0xff]  ;;  %v995_v31 = vld [vmem:[%s2047_s1 + $0x1c8] sm:$0xff]  ;;  %v1540_v37 = vld [vmem:[%s1484_s27 + $0x18] sm:$0xff] }
  0x2d   : > { %412 = vmatpush.msra.mxu2 %v1002_v62  ;;  %488 = vmatpush.msrb.mxu0 %v1049_v1  ;;  %v1529_v33 = vld [vmem:[%s1484_s27 + $0x28] sm:$0xff]  ;;  %v1543_v38 = vld [vmem:[%s1484_s27 + $0x30] sm:$0xff]  ;;  %v1546_v39 = vld [vmem:[%s1484_s27 + $0x38] sm:$0xff]  ;;  %v204_v48 = vadd.f32 %v203_v34, %v1517_v29 }
  0x2e   : > { %432 = vmatpush.msra.mxu3 %v1018_v63  ;;  %508 = vmatpush.msrb.mxu1 %v1065_v2  ;;  %v189_v41 = vmax.f32 %v1514_v28, %v1529_v33  ;;  %v978_v42 = vld [vmem:[%s2047_s1 + $0x140] sm:$0xff]  ;;  %v1562_v45 = vld [vmem:[%s1484_s27 + $0x48] sm:$0xff]  ;;  %v190_v46 = vmax.f32 %v1517_v29, %v1543_v38  ;;  %v191_v47 = vmax.f32 %v1540_v37, %v1546_v39  ;;  %v1570_v49 = vld [vmem:[%s1484_s27 + $0x50] sm:$0xff] }
  0x2f   : > { %541 = vmatpush.msrb.mxu2 %v985_v3  ;;  %489 = vmatpush.msrb.mxu0 %v1048_v5  ;;  %v994_v43 = vld [vmem:[%s2047_s1 + $0x1c0] sm:$0xff]  ;;  %v1573_v50 = vld [vmem:[%s1484_s27 + $0x58] sm:$0xff]  ;;  %v1576_v51 = vld [vmem:[%s1484_s27 + $0x70] sm:$0xff]  ;;  %v205_v59 = vadd.f32 %v204_v48, %v1540_v37 }
  0x30   : > { %561 = vmatpush.msrb.mxu3 %v1001_v4  ;;  %509 = vmatpush.msrb.mxu1 %v1064_v6  ;;  %v1559_v44 = vld [vmem:[%s1484_s27 + $0x40] sm:$0xff]  ;;  %v193_v53 = vmax.f32 %v189_v41, %v1562_v45  ;;  %v1584_v55 = vld [vmem:[%s1484_s27 + $0x68] sm:$0xff]  ;;  %v1587_v56 = vld [vmem:[%s1484_s27 + $0x78] sm:$0xff]  ;;  %v194_v57 = vmax.f32 %v190_v46, %v1570_v49  ;;  %v195_v58 = vmax.f32 %v191_v47, %v1573_v50 }
  0x31   : > { %542 = vmatpush.msrb.mxu2 %v984_v7  ;;  %490 = vmatpush.msrb.mxu0 %v1047_v9  ;;  %v192_v52 = vmax.f32 %v188_v40, %v1559_v44  ;;  %v1581_v54 = vld [vmem:[%s1484_s27 + $0x60] sm:$0xff]  ;;  %v1041_v60 = vld [vmem:[%s2047_s1 + $0x338] sm:$0xff]  ;;  %v206_v4 = vadd.f32 %v205_v59, %v1526_v32  ;;  %v1040_v5 = vld [vmem:[%s2047_s1 + $0x330] sm:$0xff] }
  0x32   : > { %562 = vmatpush.msrb.mxu3 %v1000_v8  ;;  %510 = vmatpush.msrb.mxu1 %v1063_v10  ;;  %v1057_v61 = vld [vmem:[%s2047_s1 + $0x3b8] sm:$0xff]  ;;  %v197_v63 = vmax.f32 %v193_v53, %v1584_v55  ;;  %v198_v2 = vmax.f32 %v194_v57, %v1576_v51  ;;  %v199_v3 = vmax.f32 %v195_v58, %v1587_v56  ;;  %v1056_v6 = vld [vmem:[%s2047_s1 + $0x3b0] sm:$0xff]  ;;  %v971_v47 = vld [vmem:[%s2047_s1 + $0x108] sm:$0xff] }
  0x33   : > { %543 = vmatpush.msrb.mxu2 %v983_v11  ;;  %491 = vmatpush.msrb.mxu0 %v1046_v13  ;;  %v196_v62 = vmax.f32 %v192_v52, %v1581_v54  ;;  %v977_v0 = vld [vmem:[%s2047_s1 + $0x138] sm:$0xff]  ;;  %v976_v8 = vld [vmem:[%s2047_s1 + $0x130] sm:$0xff]  ;;  %v207_v11 = vadd.f32 %v206_v4, %v1529_v33  ;;  %v1055_v13 = vld [vmem:[%s2047_s1 + $0x3a8] sm:$0xff] }
  0x34   : > { %563 = vmatpush.msrb.mxu3 %v999_v12  ;;  %511 = vmatpush.msrb.mxu1 %v1062_v14  ;;  %v993_v1 = vld [vmem:[%s2047_s1 + $0x1b8] sm:$0xff]  ;;  %v992_v9 = vld [vmem:[%s2047_s1 + $0x1b0] sm:$0xff]  ;;  %v201_v10 = vmax.f32 %v198_v2, %v199_v3  ;;  %v1039_v12 = vld [vmem:[%s2047_s1 + $0x328] sm:$0xff] }
  0x35   : > { %544 = vmatpush.msrb.mxu2 %v982_v15  ;;  %492 = vmatpush.msrb.mxu0 %v1045_v17  ;;  %v200_v7 = vmax.f32 %v196_v62, %v197_v63  ;;  %v975_v14 = vld [vmem:[%s2047_s1 + $0x128] sm:$0xff]  ;;  %v208_v17 = vadd.f32 %v207_v11, %v1543_v38  ;;  %v1036_v34 = vld [vmem:[%s2047_s1 + $0x310] sm:$0xff]  ;;  %v1034_v52 = vld [vmem:[%s2047_s1 + $0x300] sm:$0xff] }
  0x36   : > { %564 = vmatpush.msrb.mxu3 %v998_v16  ;;  %512 = vmatpush.msrb.mxu1 %v1061_v18  ;;  %v991_v15 = vld [vmem:[%s2047_s1 + $0x1a8] sm:$0xff]  ;;  %v1038_v18 = vld [vmem:[%s2047_s1 + $0x320] sm:$0xff]  ;;  %v988_v40 = vld [vmem:[%s2047_s1 + $0x190] sm:$0xff] }
  0x37   : > { %545 = vmatpush.msrb.mxu2 %v981_v19  ;;  %493 = vmatpush.msrb.mxu0 %v1044_v21  ;;  %v202_v16 = vmax.f32 %v200_v7, %v201_v10  ;;  %v1054_v19 = vld [vmem:[%s2047_s1 + $0x3a0] sm:$0xff]  ;;  %v987_v48 = vld [vmem:[%s2047_s1 + $0x188] sm:$0xff]  ;;  %v1113_v4 = vld [vmem:[%s2047_s1 + $0x578] sm:$0xff] }
  0x38   : > { %565 = vmatpush.msrb.mxu3 %v997_v20  ;;  %513 = vmatpush.msrb.mxu1 %v1060_v22  ;;  %v974_v20 = vld [vmem:[%s2047_s1 + $0x120] sm:$0xff]  ;;  %v209_v22 = vadd.f32 %v208_v17, %v1546_v39  ;;  %v1111_v11 = vld [vmem:[%s2047_s1 + $0x568] sm:$0xff]  ;;  %v1109_v17 = vld [vmem:[%s2047_s1 + $0x558] sm:$0xff] }
  0x39   : > { %546 = vmatpush.msrb.mxu2 %v980_v23  ;;  %494 = vmatpush.msrb.mxu0 %v1043_v25  ;;  %v990_v21 = vld [vmem:[%s2047_s1 + $0x1a0] sm:$0xff]  ;;  %v224_v23 = vrot.slane %v202_v16, 5  ;;  %v1053_v25 = vld [vmem:[%s2047_s1 + $0x398] sm:$0xff] }
  0x3a   : > { %566 = vmatpush.msrb.mxu3 %v996_v24  ;;  %514 = vmatpush.msrb.mxu1 %v1059_v26  ;;  %v1037_v24 = vld [vmem:[%s2047_s1 + $0x318] sm:$0xff]  ;;  %v1050_v53 = vld [vmem:[%s2047_s1 + $0x380] sm:$0xff] }
  0x3b   : > { %547 = vmatpush.msrb.mxu2 %v979_v30  ;;  %495 = vmatpush.msrb.mxu0 %v1042_v35  ;;  %v973_v26 = vld [vmem:[%s2047_s1 + $0x118] sm:$0xff]  ;;  %226 = vst [vmem:[#allocation2 + $0x10] sm:$0xf8] %v224_v23  ;;  %v1052_v35 = vld [vmem:[%s2047_s1 + $0x390] sm:$0xff]  ;;  %v970_v58 = vld [vmem:[%s2047_s1 + $0x100] sm:$0xff] }
  0x3c   : > { %567 = vmatpush.msrb.mxu3 %v995_v31  ;;  %515 = vmatpush.msrb.mxu1 %v1058_v36  ;;  %v989_v30 = vld [vmem:[%s2047_s1 + $0x198] sm:$0xff]  ;;  %v210_v31 = vadd.f32 %v209_v22, %v1559_v44  ;;  %227 = vst [vmem:[#allocation2 + $0x18] sm:$0x7] %v224_v23  ;;  %v972_v36 = vld [vmem:[%s2047_s1 + $0x110] sm:$0xff]  ;;  %v986_v59 = vld [vmem:[%s2047_s1 + $0x180] sm:$0xff] }
  0x3d   : > { %548 = vmatpush.msrb.mxu2 %v978_v42  ;;  %496 = vmatpush.msrb.mxu0 %v1041_v60  ;;  %v1035_v42 = vld [vmem:[%s2047_s1 + $0x308] sm:$0xff]  ;;  %v1074_v22 = vld [vmem:[%s2047_s1 + $0x440] sm:$0xff] }
  0x3e   : > { %568 = vmatpush.msrb.mxu3 %v994_v43  ;;  %516 = vmatpush.msrb.mxu1 %v1057_v61  ;;  %v211_v41 = vadd.f32 %v210_v31, %v1562_v45  ;;  %v1051_v43 = vld [vmem:[%s2047_s1 + $0x388] sm:$0xff]  ;;  %v1106_v23 = vld [vmem:[%s2047_s1 + $0x540] sm:$0xff] }
  0x3f   : > { %549 = vmatpush.msrb.mxu2 %v977_v0  ;;  %497 = vmatpush.msrb.mxu0 %v1040_v5  ;;  %v1080_v5 = vld [vmem:[%s2047_s1 + $0x470] sm:$0xff] }
  0x40   : > { %569 = vmatpush.msrb.mxu3 %v993_v1  ;;  %517 = vmatpush.msrb.mxu1 %v1056_v6  ;;  %v212_v46 = vadd.f32 %v211_v41, %v1570_v49  ;;  %v1081_v1 = vld [vmem:[%s2047_s1 + $0x478] sm:$0xff] }
  0x41   : > { %550 = vmatpush.msrb.mxu2 %v976_v8  ;;  %498 = vmatpush.msrb.mxu0 %v1039_v12  ;;  %v1112_v8 = vld [vmem:[%s2047_s1 + $0x570] sm:$0xff]  ;;  %v1078_v12 = vld [vmem:[%s2047_s1 + $0x460] sm:$0xff] }
  0x42   : > { %570 = vmatpush.msrb.mxu3 %v992_v9  ;;  %518 = vmatpush.msrb.mxu1 %v1055_v13  ;;  %v213_v57 = vadd.f32 %v212_v46, %v1573_v50  ;;  %v347_v60 = vld [vmem:[#allocation2 + $0x10] sm:$0xfc]  ;;  %v1079_v9 = vld [vmem:[%s2047_s1 + $0x468] sm:$0xff] }
  0x43   : > { %551 = vmatpush.msrb.mxu2 %v975_v14  ;;  %499 = vmatpush.msrb.mxu0 %v1038_v18  ;;  %v235_v61 = vld [vmem:[#allocation2 + $0x10] sm:$0xff]  ;;  %v349_v62 = vld [vmem:[#allocation2 + $0x18] sm:$0x3]  ;;  %v389_v63 = vrot.slane %v347_v60, 2  ;;  %v1110_v14 = vld [vmem:[%s2047_s1 + $0x560] sm:$0xff] }
  0x44   : > { %571 = vmatpush.msrb.mxu3 %v991_v15  ;;  %519 = vmatpush.msrb.mxu1 %v1054_v19  ;;  %v214_v0 = vadd.f32 %v213_v57, %v1581_v54  ;;  %v390_v2 = vrot.slane %v349_v62, 2  ;;  %v1077_v15 = vld [vmem:[%s2047_s1 + $0x458] sm:$0xff]  ;;  %v1076_v18 = vld [vmem:[%s2047_s1 + $0x450] sm:$0xff] }
  0x45   : > { %552 = vmatpush.msrb.mxu2 %v974_v20  ;;  %500 = vmatpush.msrb.mxu0 %v1037_v24  ;;  %v1108_v19 = vld [vmem:[%s2047_s1 + $0x550] sm:$0xff]  ;;  %v1075_v20 = vld [vmem:[%s2047_s1 + $0x448] sm:$0xff]  ;;  %v1073_v24 = vld [vmem:[%s2047_s1 + $0x438] sm:$0xff] }
  0x46   : > { %572 = vmatpush.msrb.mxu3 %v990_v21  ;;  %520 = vmatpush.msrb.mxu1 %v1053_v25  ;;  %v215_v3 = vadd.f32 %v214_v0, %v1584_v55  ;;  %v391_v6 = vsel %vm388_vm0, %v389_v63, %v390_v2  ;;  %v1107_v21 = vld [vmem:[%s2047_s1 + $0x548] sm:$0xff]  ;;  %v438_v25 = vld [vmem:[#allocation2 + $0x10] sm:$0xf8]  ;;  %v1129_v63 = vld [vmem:[%s2047_s1 + $0x5f8] sm:$0xff] }
  0x47   : > { %553 = vmatpush.msrb.mxu2 %v973_v26  ;;  %501 = vmatpush.msrb.mxu0 %v1036_v34  ;;  %v440_v26 = vld [vmem:[#allocation2 + $0x18] sm:$0x7]  ;;  %v310_v34 = vld [vmem:[#allocation2 + $0x10] sm:$0xfe]  ;;  %v1071_v0 = vld [vmem:[%s2047_s1 + $0x428] sm:$0xff] }
  0x48   : > { %573 = vmatpush.msrb.mxu3 %v989_v30  ;;  %521 = vmatpush.msrb.mxu1 %v1052_v35  ;;  %v216_v7 = vadd.f32 %v215_v3, %v1576_v51  ;;  %v480_v30 = vrot.slane %v438_v25, 3  ;;  %v481_v31 = vrot.slane %v440_v26, 3  ;;  %v312_v35 = vld [vmem:[#allocation2 + $0x18] sm:$0x1]  ;;  %v1072_v46 = vld [vmem:[%s2047_s1 + $0x430] sm:$0xff]  ;;  %v1095_v3 = vld [vmem:[%s2047_s1 + $0x4e8] sm:$0xff] }
  0x49   : > { %554 = vmatpush.msrb.mxu2 %v972_v36  ;;  %502 = vmatpush.msrb.mxu0 %v1035_v42  ;;  %v1097_v36 = vld [vmem:[%s2047_s1 + $0x4f8] sm:$0xff]  ;;  %v534_v41 = vrot.slane %v312_v35, 1  ;;  %v1096_v42 = vld [vmem:[%s2047_s1 + $0x4f0] sm:$0xff]  ;;  %v1091_v26 = vld [vmem:[%s2047_s1 + $0x4c8] sm:$0xff] }
  0x4a   : > { %574 = vmatpush.msrb.mxu3 %v988_v40  ;;  %522 = vmatpush.msrb.mxu1 %v1051_v43  ;;  %v217_v10 = vadd.f32 %v216_v7, %v1587_v56  ;;  %v533_v40 = vrot.slane %v310_v34, 1  ;;  %v1105_v43 = vld [vmem:[%s2047_s1 + $0x538] sm:$0xff]  ;;  %v1104_v60 = vld [vmem:[%s2047_s1 + $0x530] sm:$0xff]  ;;  %v1103_v7 = vld [vmem:[%s2047_s1 + $0x528] sm:$0xff] }
  0x4b   : > { %555 = vmatpush.msrb.mxu2 %v971_v47  ;;  %503 = vmatpush.msrb.mxu0 %v1034_v52  ;;  %v482_v47 = vsel %vm479_vm1, %v480_v30, %v481_v31  ;;  %v1068_v25 = vld [vmem:[%s2047_s1 + $0x410] sm:$0xff]  ;;  %v674_v31 = vld [vmem:[#allocation2 + $0x18] sm:$0x1f]  ;;  %v1067_v35 = vld [vmem:[%s2047_s1 + $0x408] sm:$0xff] }
  0x4c   : > { %575 = vmatpush.msrb.mxu3 %v987_v48  ;;  %523 = vmatpush.msrb.mxu1 %v1050_v53  ;;  %v218_v13 = vmul.f32 0.0625, %v217_v10  ;;  %v535_v57 = vsel %vm532_vm2, %v533_v40, %v534_v41  ;;  %v1094_v10 = vld [vmem:[%s2047_s1 + $0x4e0] sm:$0xff]  ;;  %v672_v30 = vld [vmem:[#allocation2 + $0x10] sm:$0xe0] }
  0x4d   : > { %556 = vmatpush.msrb.mxu2 %v970_v58  ;;  %285 = vmatmul.f32.vlgmr.msra.gmra.mxu0 %v235_v61  ;;  %v1100_v34 = vld [vmem:[%s2047_s1 + $0x510] sm:$0xff] }
  0x4e   : > { %576 = vmatpush.msrb.mxu3 %v986_v59  ;;  %631 = vmatpush.msra.mxu0 %v1081_v1  ;;  %v229_v16 = vrot.slane %v218_v13, 5  ;;  %v1124_v41 = vld [vmem:[%s2047_s1 + $0x5d0] sm:$0xff] }
  0x4f   : > { %413 = vmatmul.f32.vlgmr.msra.gmra.mxu2 %v391_v6 }
  0x50   : > { %722 = vmatpush.msra.mxu2 %v1113_v4  ;;  %632 = vmatpush.msra.mxu0 %v1080_v5  ;;  %231 = vst [vmem:[#allocation2] sm:$0xf8] %v229_v16 }
  0x51   : > { %232 = vst [vmem:[#allocation2 + $0x8] sm:$0x7] %v229_v16  ;;  %v1093_v16 = vld [vmem:[%s2047_s1 + $0x4d8] sm:$0xff] }
  0x52   : > { %723 = vmatpush.msra.mxu2 %v1112_v8  ;;  %633 = vmatpush.msra.mxu0 %v1079_v9  ;;  %v1070_v8 = vld [vmem:[%s2047_s1 + $0x420] sm:$0xff]  ;;  %v1128_v9 = vld [vmem:[%s2047_s1 + $0x5f0] sm:$0xff] }
  0x54   : > { %724 = vmatpush.msra.mxu2 %v1111_v11  ;;  %634 = vmatpush.msra.mxu0 %v1078_v12  ;;  %v1102_v11 = vld [vmem:[%s2047_s1 + $0x520] sm:$0xff] }
  0x55   : > { %504 = vmatmul.f32.vlgmr.msrb.gmra.mxu0 %v482_v47  ;;  %v714_v47 = vrot.slane %v672_v30, 5  ;;  %v1161_v30 = vld [vmem:[%s2047_s1 + $0x6f8] sm:$0xff] }
  0x56   : > { %725 = vmatpush.msra.mxu2 %v1110_v14  ;;  %635 = vmatpush.msra.mxu0 %v1077_v15  ;;  %v1127_v15 = vld [vmem:[%s2047_s1 + $0x5e8] sm:$0xff] }
  0x57   : > { %v348_v48 = vld [vmem:[#allocation2] sm:$0xfc]  ;;  %557 = vmatmul.f32.vlgmr.msrb.gmra.mxu2 %v535_v57 }
  0x58   : > { %726 = vmatpush.msra.mxu2 %v1109_v17  ;;  %636 = vmatpush.msra.mxu0 %v1076_v18  ;;  %v236_v52 = vld [vmem:[#allocation2] sm:$0xff]  ;;  %v350_v58 = vld [vmem:[#allocation2 + $0x8] sm:$0x3]  ;;  %v392_v59 = vrot.slane %v348_v48, 2  ;;  %v1069_v18 = vld [vmem:[%s2047_s1 + $0x418] sm:$0xff]  ;;  %v715_v48 = vrot.slane %v674_v31, 5 }
  0x59   : > { %v439_v53 = vld [vmem:[#allocation2] sm:$0xf8]  ;;  %305 = vmatmul.f32.vlgmr.msra.gmra.mxu1 %v236_v52  ;;  %v441_v61 = vld [vmem:[#allocation2 + $0x8] sm:$0x7]  ;;  %v393_v62 = vrot.slane %v350_v58, 2 }
  0x5a   : > { %727 = vmatpush.msra.mxu2 %v1108_v19  ;;  %637 = vmatpush.msra.mxu0 %v1075_v20  ;;  %v483_v1 = vrot.slane %v439_v53, 3  ;;  %v484_v2 = vrot.slane %v441_v61, 3  ;;  %v311_v4 = vld [vmem:[#allocation2] sm:$0xfe]  ;;  %v313_v5 = vld [vmem:[#allocation2 + $0x8] sm:$0x1]  ;;  %v716_v61 = vsel %vm713_vm4, %v714_v47, %v715_v48 }
  0x5b   : > { %651 = vmatpush.msra.mxu1 %v1097_v36  ;;  %v394_v6 = vsel %vm388_vm0, %v392_v59, %v393_v62  ;;  %v536_v13 = vrot.slane %v311_v4, 1  ;;  %v537_v14 = vrot.slane %v313_v5, 1  ;;  %v1126_v17 = vld [vmem:[%s2047_s1 + $0x5e0] sm:$0xff]  ;;  %v1101_v19 = vld [vmem:[%s2047_s1 + $0x518] sm:$0xff]  ;;  %v1092_v20 = vld [vmem:[%s2047_s1 + $0x4d0] sm:$0xff] }
  0x5c   : > { %728 = vmatpush.msra.mxu2 %v1107_v21  ;;  %638 = vmatpush.msra.mxu0 %v1074_v22  ;;  %v485_v12 = vsel %vm479_vm1, %v483_v1, %v484_v2  ;;  %v581_v21 = vld [vmem:[#allocation2 + $0x10] sm:$0xf0]  ;;  %v583_v22 = vld [vmem:[#allocation2 + $0x18] sm:$0xf]  ;;  %v1123_v52 = vld [vmem:[%s2047_s1 + $0x5c8] sm:$0xff] }
  0x5d   : > { %652 = vmatpush.msra.mxu1 %v1096_v42  ;;  %433 = vmatmul.f32.vlgmr.msra.gmra.mxu3 %v394_v6  ;;  %v623_v36 = vrot.slane %v581_v21, 4  ;;  %v624_v40 = vrot.slane %v583_v22, 4  ;;  %v1090_v42 = vld [vmem:[%s2047_s1 + $0x4c0] sm:$0xff]  ;;  %v1089_v53 = vld [vmem:[%s2047_s1 + $0x4b8] sm:$0xff]  ;;  %v1144_v1 = vld [vmem:[%s2047_s1 + $0x670] sm:$0xff] }
  0x5e   : > { %729 = vmatpush.msra.mxu2 %v1106_v23  ;;  %639 = vmatpush.msra.mxu0 %v1073_v24  ;;  %v1125_v23 = vld [vmem:[%s2047_s1 + $0x5d8] sm:$0xff]  ;;  %v538_v24 = vsel %vm532_vm2, %v536_v13, %v537_v14  ;;  %v1098_v57 = vld [vmem:[%s2047_s1 + $0x500] sm:$0xff]  ;;  %v1120_v2 = vld [vmem:[%s2047_s1 + $0x5b0] sm:$0xff] }
  0x5f   : > { %742 = vmatpush.msra.mxu3 %v1129_v63  ;;  %653 = vmatpush.msra.mxu1 %v1095_v3  ;;  %v625_v58 = vsel %vm622_vm3, %v623_v36, %v624_v40  ;;  %v1122_v59 = vld [vmem:[%s2047_s1 + $0x5c0] sm:$0xff]  ;;  %v1145_v62 = vld [vmem:[%s2047_s1 + $0x678] sm:$0xff]  ;;  %v1119_v4 = vld [vmem:[%s2047_s1 + $0x5a8] sm:$0xff] }
  0x60   : > { %730 = vmatpush.msra.mxu2 %v1105_v43  ;;  %640 = vmatpush.msra.mxu0 %v1072_v46  ;;  %v1099_v43 = vld [vmem:[%s2047_s1 + $0x508] sm:$0xff]  ;;  %v1066_v46 = vld [vmem:[%s2047_s1 + $0x400] sm:$0xff]  ;;  %v1121_v63 = vld [vmem:[%s2047_s1 + $0x5b8] sm:$0xff] }
  0x61   : > { %743 = vmatpush.msra.mxu3 %v1128_v9  ;;  %654 = vmatpush.msra.mxu1 %v1094_v10  ;;  %v1086_v3 = vld [vmem:[%s2047_s1 + $0x4a0] sm:$0xff]  ;;  %v1143_v5 = vld [vmem:[%s2047_s1 + $0x668] sm:$0xff]  ;;  %v1085_v6 = vld [vmem:[%s2047_s1 + $0x498] sm:$0xff] }
  0x62   : > { %731 = vmatpush.msra.mxu2 %v1104_v60  ;;  %641 = vmatpush.msra.mxu0 %v1071_v0  ;;  %v1088_v60 = vld [vmem:[%s2047_s1 + $0x4b0] sm:$0xff]  ;;  %v1087_v0 = vld [vmem:[%s2047_s1 + $0x4a8] sm:$0xff]  ;;  %v1142_v9 = vld [vmem:[%s2047_s1 + $0x660] sm:$0xff] }
  0x63   : > { %524 = vmatmul.f32.vlgmr.msrb.gmra.mxu1 %v485_v12  ;;  %744 = vmatpush.msra.mxu3 %v1127_v15  ;;  %v1118_v10 = vld [vmem:[%s2047_s1 + $0x5a0] sm:$0xff]  ;;  %v1117_v12 = vld [vmem:[%s2047_s1 + $0x598] sm:$0xff] }
  0x64   : > { %732 = vmatpush.msra.mxu2 %v1103_v7  ;;  %642 = vmatpush.msra.mxu0 %v1070_v8  ;;  %v582_v7 = vld [vmem:[#allocation2] sm:$0xf0]  ;;  %v584_v8 = vld [vmem:[#allocation2 + $0x8] sm:$0xf]  ;;  %v1141_v15 = vld [vmem:[%s2047_s1 + $0x658] sm:$0xff] }
  0x65   : > { %655 = vmatpush.msra.mxu1 %v1093_v16  ;;  %745 = vmatpush.msra.mxu3 %v1126_v17  ;;  %v626_v13 = vrot.slane %v582_v7, 4  ;;  %v627_v14 = vrot.slane %v584_v8, 4  ;;  %v1083_v16 = vld [vmem:[%s2047_s1 + $0x488] sm:$0xff]  ;;  %v673_v17 = vld [vmem:[#allocation2] sm:$0xe0]  ;;  %v1137_v40 = vld [vmem:[%s2047_s1 + $0x638] sm:$0xff] }
  0x66   : > { %733 = vmatpush.msra.mxu2 %v1102_v11  ;;  %643 = vmatpush.msra.mxu0 %v1069_v18  ;;  %v1084_v11 = vld [vmem:[%s2047_s1 + $0x490] sm:$0xff]  ;;  %v675_v18 = vld [vmem:[#allocation2 + $0x8] sm:$0x1f]  ;;  %v1082_v21 = vld [vmem:[%s2047_s1 + $0x480] sm:$0xff] }
  0x67   : > { %656 = vmatpush.msra.mxu1 %v1092_v20  ;;  %577 = vmatmul.f32.vlgmr.msrb.gmra.mxu3 %v538_v24  ;;  %v1116_v20 = vld [vmem:[%s2047_s1 + $0x590] sm:$0xff]  ;;  %v628_v22 = vsel %vm622_vm3, %v626_v13, %v627_v14  ;;  %v718_v24 = vrot.slane %v675_v18, 5  ;;  %v1138_v31 = vld [vmem:[%s2047_s1 + $0x640] sm:$0xff]  ;;  %v1157_v47 = vld [vmem:[%s2047_s1 + $0x6d8] sm:$0xff] }
  0x68   : > { %734 = vmatpush.msra.mxu2 %v1101_v19  ;;  %644 = vmatpush.msra.mxu0 %v1068_v25  ;;  %v1140_v19 = vld [vmem:[%s2047_s1 + $0x650] sm:$0xff]  ;;  %v1139_v25 = vld [vmem:[%s2047_s1 + $0x648] sm:$0xff]  ;;  %v1134_v48 = vld [vmem:[%s2047_s1 + $0x620] sm:$0xff] }
  0x69   : > { %746 = vmatpush.msra.mxu3 %v1125_v23  ;;  %657 = vmatpush.msra.mxu1 %v1091_v26  ;;  %v717_v23 = vrot.slane %v673_v17, 5  ;;  %v1115_v26 = vld [vmem:[%s2047_s1 + $0x588] sm:$0xff]  ;;  %v1149_v7 = vld [vmem:[%s2047_s1 + $0x698] sm:$0xff]  ;;  %v764_v8 = vld [vmem:[#allocation2] sm:$0xc0] }
  0x6a   : > { %735 = vmatpush.msra.mxu2 %v1100_v34  ;;  %645 = vmatpush.msra.mxu0 %v1067_v35  ;;  %v1114_v34 = vld [vmem:[%s2047_s1 + $0x580] sm:$0xff]  ;;  %v1160_v35 = vld [vmem:[%s2047_s1 + $0x6f0] sm:$0xff]  ;;  %v1147_v13 = vld [vmem:[%s2047_s1 + $0x688] sm:$0xff] }
  0x6b   : > { %747 = vmatpush.msra.mxu3 %v1124_v41  ;;  %658 = vmatpush.msra.mxu1 %v1090_v42  ;;  %v719_v36 = vsel %vm713_vm4, %v717_v23, %v718_v24  ;;  %v1159_v41 = vld [vmem:[%s2047_s1 + $0x6e8] sm:$0xff]  ;;  %v1136_v42 = vld [vmem:[%s2047_s1 + $0x630] sm:$0xff]  ;;  %v1146_v14 = vld [vmem:[%s2047_s1 + $0x680] sm:$0xff] }
  0x6c   : > { %736 = vmatpush.msra.mxu2 %v1099_v43  ;;  %646 = vmatpush.msra.mxu0 %v1066_v46  ;;  %v1158_v43 = vld [vmem:[%s2047_s1 + $0x6e0] sm:$0xff]  ;;  %v1135_v46 = vld [vmem:[%s2047_s1 + $0x628] sm:$0xff] }
  0x6d   : > { %748 = vmatpush.msra.mxu3 %v1123_v52  ;;  %659 = vmatpush.msra.mxu1 %v1089_v53  ;;  %v1156_v52 = vld [vmem:[%s2047_s1 + $0x6d0] sm:$0xff]  ;;  %v1133_v53 = vld [vmem:[%s2047_s1 + $0x618] sm:$0xff] }
  0x6e   : > { %737 = vmatpush.msra.mxu2 %v1098_v57  ;;  %647 = vmatmul.f32.vlgmr.msra.gmra.mxu0 %v625_v58  ;;  %v763_v57 = vld [vmem:[#allocation2 + $0x10] sm:$0xc0]  ;;  %v765_v58 = vld [vmem:[#allocation2 + $0x18] sm:$0x3f] }
  0x6f   : > { %749 = vmatpush.msra.mxu3 %v1122_v59  ;;  %660 = vmatpush.msra.mxu1 %v1088_v60  ;;  %v1155_v59 = vld [vmem:[%s2047_s1 + $0x6c8] sm:$0xff]  ;;  %v1132_v60 = vld [vmem:[%s2047_s1 + $0x610] sm:$0xff] }
  0x70   : > { %738 = vmatmul.f32.vlgmr.msra.gmra.mxu2 %v716_v61  ;;  %813 = vmatpush.msrb.mxu0 %v1145_v62  ;;  %v1154_v61 = vld [vmem:[%s2047_s1 + $0x6c0] sm:$0xff]  ;;  %v805_v62 = vrot.slane %v763_v57, 6 }
  0x71   : > { %750 = vmatpush.msra.mxu3 %v1121_v63  ;;  %661 = vmatpush.msra.mxu1 %v1087_v0  ;;  %v806_v63 = vrot.slane %v765_v58, 6  ;;  %v1131_v0 = vld [vmem:[%s2047_s1 + $0x608] sm:$0xff] }
  0x72   : > { %814 = vmatpush.msrb.mxu0 %v1144_v1  ;;  %v1153_v1 = vld [vmem:[%s2047_s1 + $0x6b8] sm:$0xff] }
  0x73   : > { %751 = vmatpush.msra.mxu3 %v1120_v2  ;;  %662 = vmatpush.msra.mxu1 %v1086_v3  ;;  %v1130_v2 = vld [vmem:[%s2047_s1 + $0x600] sm:$0xff]  ;;  %v1152_v3 = vld [vmem:[%s2047_s1 + $0x6b0] sm:$0xff] }
  0x74   : > { %815 = vmatpush.msrb.mxu0 %v1143_v5  ;;  %v1151_v5 = vld [vmem:[%s2047_s1 + $0x6a8] sm:$0xff] }
  0x75   : > { %752 = vmatpush.msra.mxu3 %v1119_v4  ;;  %663 = vmatpush.msra.mxu1 %v1085_v6  ;;  %v807_v4 = vsel %vm804_vm5, %v805_v62, %v806_v63  ;;  %v1150_v6 = vld [vmem:[%s2047_s1 + $0x6a0] sm:$0xff] }
  0x76   : > { %816 = vmatpush.msrb.mxu0 %v1142_v9  ;;  %v766_v9 = vld [vmem:[#allocation2 + $0x8] sm:$0x3f] }
  0x77   : > { %753 = vmatpush.msra.mxu3 %v1118_v10  ;;  %664 = vmatpush.msra.mxu1 %v1084_v11  ;;  %v1148_v10 = vld [vmem:[%s2047_s1 + $0x690] sm:$0xff]  ;;  %v808_v11 = vrot.slane %v764_v8, 6 }
  0x78   : > { %817 = vmatpush.msrb.mxu0 %v1141_v15 }
  0x79   : > { %754 = vmatpush.msra.mxu3 %v1117_v12  ;;  %665 = vmatpush.msra.mxu1 %v1083_v16  ;;  %v809_v12 = vrot.slane %v766_v9, 6 }
  0x7a   : > { %818 = vmatpush.msrb.mxu0 %v1140_v19 }
  0x7b   : > { %755 = vmatpush.msra.mxu3 %v1116_v20  ;;  %666 = vmatpush.msra.mxu1 %v1082_v21  ;;  %v810_v15 = vsel %vm804_vm5, %v808_v11, %v809_v12 }
  0x7c   : > { %667 = vmatmul.f32.vlgmr.msra.gmra.mxu1 %v628_v22  ;;  %819 = vmatpush.msrb.mxu0 %v1139_v25 }
  0x7d   : > { %756 = vmatpush.msra.mxu3 %v1115_v26  ;;  %833 = vmatpush.msrb.mxu1 %v1161_v30  ;;  %v234_v26 = vstv %s233_s11 }
  0x7e   : > { %820 = vmatpush.msrb.mxu0 %v1138_v31 }
  0x7f   : > { %757 = vmatpush.msra.mxu3 %v1114_v34  ;;  %834 = vmatpush.msrb.mxu1 %v1160_v35 }
  0x80   : > { %758 = vmatmul.f32.vlgmr.msra.gmra.mxu3 %v719_v36  ;;  %821 = vmatpush.msrb.mxu0 %v1137_v40 }
  0x81   : > { %835 = vmatpush.msrb.mxu1 %v1159_v41 }
  0x82   : > { %822 = vmatpush.msrb.mxu0 %v1136_v42 }
  0x83   : > { %836 = vmatpush.msrb.mxu1 %v1158_v43 }
  0x84   : > { %823 = vmatpush.msrb.mxu0 %v1135_v46 }
  0x85   : > { %837 = vmatpush.msrb.mxu1 %v1157_v47 }
  0x86   : > { %824 = vmatpush.msrb.mxu0 %v1134_v48 }
  0x87   : > { %838 = vmatpush.msrb.mxu1 %v1156_v52 }
  0x88   : > { %825 = vmatpush.msrb.mxu0 %v1133_v53 }
  0x89   : > { %839 = vmatpush.msrb.mxu1 %v1155_v59 }
  0x8a   : > { %826 = vmatpush.msrb.mxu0 %v1132_v60 }
  0x8b   : > { %840 = vmatpush.msrb.mxu1 %v1154_v61 }
  0x8c   : > { %827 = vmatpush.msrb.mxu0 %v1131_v0 }
  0x8d   : > { %841 = vmatpush.msrb.mxu1 %v1153_v1 }
  0x8e   : > { %828 = vmatpush.msrb.mxu0 %v1130_v2 }
  0x8f   : > { %842 = vmatpush.msrb.mxu1 %v1152_v3  ;;  %829 = vmatmul.f32.vlgmr.msrb.gmra.mxu0 %v807_v4 }
  0x91   : > { %843 = vmatpush.msrb.mxu1 %v1151_v5 }
  0x93   : > { %844 = vmatpush.msrb.mxu1 %v1150_v6 }
  0x95   : > { %845 = vmatpush.msrb.mxu1 %v1149_v7 }
  0x97   : > { %846 = vmatpush.msrb.mxu1 %v1148_v10 }
  0x99   : > { %847 = vmatpush.msrb.mxu1 %v1147_v13 }
  0x9b   : > { %848 = vmatpush.msrb.mxu1 %v1146_v14 }
  0x9c   : > { %849 = vmatmul.f32.vlgmr.msrb.gmra.mxu1 %v810_v15 }
  0xca   : > { %v286_v16 = vpop.f32.mrf.mxu0 }
  0xd2   : > { %v414_v18 = vpop.f32.mrf.mxu2  ;;  %v505_v20 = vpop.f32.mrf.mxu0 }
  0xd6   : > { %v306_v17 = vpop.f32.mrf.mxu1 }
  0xd7   : > { %v307_v25 = vadd.f32 %v306_v17, %v286_v16 }
  0xd9   : > { %v309_v34 = vadd.f32 %v307_v25, %v234_v26 }
  0xda   : > { %v558_v22 = vpop.f32.mrf.mxu2 }
  0xe0   : > { %v434_v19 = vpop.f32.mrf.mxu3  ;;  %v525_v21 = vpop.f32.mrf.mxu1 }
  0xe1   : > { %v526_v31 = vadd.f32 %v525_v21, %v505_v20  ;;  %v435_v35 = vadd.f32 %v434_v19, %v414_v18 }
  0xe3   : > { %v559_v41 = vadd.f32 %v558_v22, %v526_v31  ;;  %v437_v46 = vadd.f32 %v435_v35, %v309_v34 }
  0xea   : > { %v578_v23 = vpop.f32.mrf.mxu3 }
  0xeb   : > { %v648_v24 = vpop.f32.mrf.mxu0  ;;  %v579_v52 = vadd.f32 %v578_v23, %v559_v41 }
  0xf3   : > { %v739_v36 = vpop.f32.mrf.mxu2 }
  0xf9   : > { %v668_v30 = vpop.f32.mrf.mxu1 }
  0xfa   : > { %v669_v42 = vadd.f32 %v668_v30, %v648_v24 }
  0xfc   : > { %v671_v53 = vadd.f32 %v669_v42, %v437_v46 }
 0x103   : > { %v759_v40 = vpop.f32.mrf.mxu3 }
 0x104   : > { %v760_v47 = vadd.f32 %v759_v40, %v739_v36 }
 0x106   : > { %v762_v58 = vadd.f32 %v760_v47, %v579_v52 }
 0x10c   : > { %v830_v43 = vpop.f32.mrf.mxu0 }
 0x119   : > { %v850_v48 = vpop.f32.mrf.mxu1 }
 0x11a   : > { %v851_v57 = vadd.f32 %v850_v48, %v830_v43 }
 0x11c   : > { %v853_v59 = vadd.f32 %v851_v57, %v671_v53 }
 0x11e   : > { %v854_v60 = vadd.f32 %v853_v59, %v762_v58 }
 0x120   : > { %v1162_v61 = vmul.f32 -1.442695, %v854_v60 }
 0x122   : > { %1176 = vpow2.f32 %v1162_v61 }
 0x128   : > { %v1177_v62 = vpop.eup %1176 }
 0x129   : > { %v858_v63 = vadd.f32 1.0, %v1177_v62 }
 0x12b   : > { %1178 = vrcp.f32 %v858_v63  ;;  %v870_v3 = vand.u32 2147483648, %v858_v63  ;;  %v868_v5 = vand.u32 2147483647, %v858_v63  ;;  %vm864_vm7 = vweird.f32 %v858_v63 }
 0x12d   : > { %v871_v7 = vor.u32 1.1754944e-38, %v870_v3  ;;  %vm869_vm9 = vcmp.eq.f32.partialorder %v868_v5, 8.507059e+37 }
 0x131   : > { %v1179_v0 = vpop.eup %1178 }
 0x132   : > { %v860_v1 = vmul.f32 %v1179_v0, %v858_v63  ;;  %vm865_vm6 = vweird.f32 %v1179_v0 }
 0x133   : > { %vm866_vm8 = vmor %vm864_vm7, %vm865_vm6 }
 0x134   : > { %v861_v2 = vsub.f32 1.0, %v860_v1 }
 0x136   : > { %v862_v4 = vmul.f32 %v1179_v0, %v861_v2 }
 0x138   : > { %v863_v6 = vadd.f32 %v1179_v0, %v862_v4 }
 0x13a   : > { %v867_v8 = vsel %vm866_vm8, %v1179_v0, %v863_v6 }
 0x13b   : > { %v872_v9 = vsel %vm869_vm9, %v871_v7, %v867_v8 }
 0x13c   : > { %v874_v10 = vmul.f32 %v872_v9, %v1511_v27  ;;  %v875_v11 = vmul.f32 %v872_v9, %v1514_v28  ;;  %v876_v12 = vmul.f32 %v872_v9, %v1517_v29  ;;  %v877_v13 = vmul.f32 %v872_v9, %v1540_v37 }
 0x13d   : > { %v878_v14 = vmul.f32 %v872_v9, %v1526_v32  ;;  %v879_v15 = vmul.f32 %v872_v9, %v1529_v33  ;;  %v880_v16 = vmul.f32 %v872_v9, %v1543_v38  ;;  %v881_v27 = vmul.f32 %v872_v9, %v1546_v39 }
 0x13e   : > { %890 = vst [vmem:[%s2009_s16] sm:$0xff] %v874_v10  ;;  %v882_v28 = vmul.f32 %v872_v9, %v1559_v44  ;;  %v883_v29 = vmul.f32 %v872_v9, %v1562_v45  ;;  %v884_v32 = vmul.f32 %v872_v9, %v1570_v49  ;;  %v885_v33 = vmul.f32 %v872_v9, %v1573_v50 }
 0x13f   : > { %891 = vst [vmem:[%s2009_s16 + $0x8] sm:$0xff] %v875_v11  ;;  %v886_v37 = vmul.f32 %v872_v9, %v1581_v54  ;;  %v887_v38 = vmul.f32 %v872_v9, %v1584_v55  ;;  %v888_v39 = vmul.f32 %v872_v9, %v1576_v51  ;;  %v889_v44 = vmul.f32 %v872_v9, %v1587_v56 }
 0x140   : > { %892 = vst [vmem:[%s2009_s16 + $0x10] sm:$0xff] %v876_v12 }
 0x141   : > { %893 = vst [vmem:[%s2009_s16 + $0x18] sm:$0xff] %v877_v13 }
 0x142   : > { %894 = vst [vmem:[%s2009_s16 + $0x20] sm:$0xff] %v878_v14 }
 0x143   : > { %895 = vst [vmem:[%s2009_s16 + $0x28] sm:$0xff] %v879_v15 }
 0x144   : > { %896 = vst [vmem:[%s2009_s16 + $0x30] sm:$0xff] %v880_v16 }
 0x145   : > { %897 = vst [vmem:[%s2009_s16 + $0x38] sm:$0xff] %v881_v27 }
 0x146   : > { %898 = vst [vmem:[%s2009_s16 + $0x40] sm:$0xff] %v882_v28 }
 0x147   : > { %899 = vst [vmem:[%s2009_s16 + $0x48] sm:$0xff] %v883_v29 }
 0x148   : > { %900 = vst [vmem:[%s2009_s16 + $0x50] sm:$0xff] %v884_v32 }
 0x149   : > { %901 = vst [vmem:[%s2009_s16 + $0x58] sm:$0xff] %v885_v33 }
 0x14a   : > { %902 = vst [vmem:[%s2009_s16 + $0x60] sm:$0xff] %v886_v37 }
 0x14b   : > { %903 = vst [vmem:[%s2009_s16 + $0x68] sm:$0xff] %v887_v38 }
 0x14c   : > { %904 = vst [vmem:[%s2009_s16 + $0x70] sm:$0xff] %v888_v39 }
 0x14d   : > { %905 = vst [vmem:[%s2009_s16 + $0x78] sm:$0xff] %v889_v44 }
 0x14e PF: > { %s14_s14 = sadd.s32 1, %s1186_s14  }
 0x14f   : > { %p11_p4 = scmp.ge.s32.totalorder %s14_s14, 4  }
 0x151   :  { %13 = sbr.rel (!%p11_p4) target bundleno = 2 (0x2), region = 68 }

</bundles_post_ra>
